<compile_context>
chip_gen: v7x
topology: tpu7x:2x2x1
jax: 0.10.0
libtpu: 0.0.40
codegen_flags: <defaults>
</compile_context>

<pallas_src>
import functools

import numpy as np
import jax
import jax.numpy as jnp
from jax import lax
from jax.experimental import pallas as pl
from jax.experimental.pallas import tpu as pltpu

NCOEF = 21  # [A0,B0,C0, A1,B1,C1, Az,Bz,Cz, An,Bn,Cn, Ar,Br,Cr, Ag,Bg,Cg, Ab,Bb,Cb]


def _raster_kernel(num_faces, width, height, rows_tile, fd_ref, out_ref):
    """fd_ref: SMEM (NCOEF, B*F) f32.  out_ref: VMEM (1, 3, rows_tile, 128) f32."""
    b = pl.program_id(0)
    t = pl.program_id(1)

    # --- lane-dense pixel coordinates for this tile (computed once per tile) ---
    row_base = t * rows_tile
    r_iota = lax.broadcasted_iota(jnp.int32, (rows_tile, 128), 0)
    c_iota = lax.broadcasted_iota(jnp.int32, (rows_tile, 128), 1)
    flat = (row_base + r_iota) * 128 + c_iota          # flattened pixel index
    if (width & (width - 1)) == 0:                      # power-of-two fast path
        shift = width.bit_length() - 1
        iy = flat >> shift
        ix = flat & (width - 1)
    else:                                               # generic path
        iy = flat // width
        ix = flat - iy * width
    # pixel centers mapped to NDC [-1, 1]
    px = (ix.astype(jnp.float32) + 0.5) * (2.0 / width) - 1.0
    py = (iy.astype(jnp.float32) + 0.5) * (2.0 / height) - 1.0

    base_col = b * num_faces

    def body(f, carry):
        depth, cr, cg, cb = carry
        col = base_col + f
        a0 = fd_ref[0, col]
        b0 = fd_ref[1, col]
        c0 = fd_ref[2, col]
        a1 = fd_ref[3, col]
        b1 = fd_ref[4, col]
        c1 = fd_ref[5, col]
        az = fd_ref[6, col]
        bz = fd_ref[7, col]
        cz = fd_ref[8, col]
        an = fd_ref[9, col]
        bn = fd_ref[10, col]
        cn = fd_ref[11, col]

        l0 = a0 * px + b0 * py + c0
        l1 = a1 * px + b1 * py + c1
        l2 = 1.0 - l0 - l1
        z = az * px + bz * py + cz
        inside = jnp.minimum(jnp.minimum(l0, l1), l2) >= 0.0
        hit = inside & (z < depth)

        # light_dir = (0, 0, 1) -> diffuse = clamp(interp(normal_z), min=0)
        diffuse = jnp.maximum(an * px + bn * py + cn, 0.0)

        new_cols = []
        for ch, cur in enumerate((cr, cg, cb)):
            ac = fd_ref[12 + 3 * ch, col]
            bc = fd_ref[13 + 3 * ch, col]
            cc = fd_ref[14 + 3 * ch, col]
            val = (ac * px + bc * py + cc) * diffuse
            new_cols.append(jnp.where(hit, val, cur))
        depth = jnp.where(hit, z, depth)
        return (depth, new_cols[0], new_cols[1], new_cols[2])

    init = (jnp.full((rows_tile, 128), jnp.inf, jnp.float32),
            jnp.zeros((rows_tile, 128), jnp.float32),
            jnp.zeros((rows_tile, 128), jnp.float32),
            jnp.zeros((rows_tile, 128), jnp.float32))
    _, cr, cg, cb = lax.fori_loop(0, num_faces, body, init)

    out_ref[0, 0, :, :] = cr
    out_ref[0, 1, :, :] = cg
    out_ref[0, 2, :, :] = cb


def perspective_projection(fov, aspect_ratio, near, far):
    fov_rad = np.radians(fov)
    f = 1.0 / np.tan(fov_rad / 2.0)
    return jnp.array(
        [[f / aspect_ratio, 0.0, 0.0, 0.0],
         [0.0, f, 0.0, 0.0],
         [0.0, 0.0, (far + near) / (near - far), 2.0 * far * near / (near - far)],
         [0.0, 0.0, -1.0, 0.0]], dtype=jnp.float32)


def compute_normals(vertices, faces):
    f0, f1, f2 = faces[:, 0], faces[:, 1], faces[:, 2]
    v0 = vertices[:, f0]
    v1 = vertices[:, f1]
    v2 = vertices[:, f2]
    n = jnp.cross(v1 - v0, v2 - v0)
    n = n / jnp.maximum(jnp.linalg.norm(n, axis=-1, keepdims=True), 1e-12)
    return n  # (B, F, 3)


def differentiable_rasterizer(vertices, faces, vertex_colors, image_size):
    """vertices: (B, N, 3) f32, faces: (F, 3) int, vertex_colors: (B, N, 3) f32.
    Returns shaded features in NCHW: (B, 3, image_size, image_size) f32."""
    B, N, _ = vertices.shape
    num_faces = faces.shape[0]
    faces = faces.astype(jnp.int32)  # TODO(synk): torch.int64 faces -> int32 (TPU default)

    # --- JAX glue: projection + clip-space transform (matches PyTorch math) ---
    proj = perspective_projection(60.0, 1.0, 0.1, 100.0)
    v_hom = jnp.concatenate([vertices, jnp.ones_like(vertices[..., :1])], axis=-1)
    v_proj = v_hom @ proj.T
    v_proj = v_proj[..., :3] / v_proj[..., 3:]
    xy = -v_proj[..., :2]              # vertices_clip[..., :2] = -...
    zc = v_proj[..., 2:3] * 2.0 - 1.0  # vertices_clip[..., 2] = z*2 - 1
    v_screen = jnp.concatenate([xy, zc], axis=-1)  # (B, N, 3), homogeneous w == 1

    normals = compute_normals(vertices, faces)  # (B, F, 3)

    # --- per-face affine plane coefficients (precomputed; VALU work moves out of kernel) ---
    f0, f1, f2 = faces[:, 0], faces[:, 1], faces[:, 2]
    p0, p1, p2 = v_screen[:, f0], v_screen[:, f1], v_screen[:, f2]          # (B, F, 3)
    c0, c1, c2 = vertex_colors[:, f0], vertex_colors[:, f1], vertex_colors[:, f2]
    x0, y0, z0 = p0[..., 0], p0[..., 1], p0[..., 2]
    x1, y1, z1 = p1[..., 0], p1[..., 1], p1[..., 2]
    x2, y2, z2 = p2[..., 0], p2[..., 1], p2[..., 2]

    det = (y1 - y2) * (x0 - x2) + (x2 - x1) * (y0 - y2)
    valid = jnp.abs(det) > 1e-8
    inv = jnp.where(valid, 1.0 / jnp.where(valid, det, 1.0), 0.0)
    A0 = (y1 - y2) * inv; B0 = (x2 - x1) * inv; C0 = -(A0 * x2 + B0 * y2)
    A1 = (y2 - y0) * inv; B1 = (x0 - x2) * inv; C1 = -(A1 * x2 + B1 * y2)
    A2 = -(A0 + A1);      B2 = -(B0 + B1);      C2 = 1.0 - C0 - C1

    def affine(a0, a1, a2):  # attribute -> A*px + B*py + C plane coefficients
        return (A0 * a0 + A1 * a1 + A2 * a2,
                B0 * a0 + B1 * a1 + B2 * a2,
                C0 * a0 + C1 * a1 + C2 * a2)

    Az, Bz, Cz = affine(z0, z1, z2)

    # TODO(synk): the original dr.interpolate indexes the per-FACE normal table by
    # VERTEX ids; we replicate that literally, clamping indices to avoid the OOB
    # read the original would perform when a vertex id >= num_faces.
    g0 = jnp.clip(f0, 0, num_faces - 1)
    g1 = jnp.clip(f1, 0, num_faces - 1)
    g2 = jnp.clip(f2, 0, num_faces - 1)
    An, Bn, Cn = affine(normals[:, g0, 2], normals[:, g1, 2], normals[:, g2, 2])

    col_coefs = []
    for ch in range(3):
        col_coefs.extend(affine(c0[..., ch], c1[..., ch], c2[..., ch]))

    # Fold degenerate-face rejection into the l0 constant (never passes inside-test).
    C0_l = jnp.where(valid, C0, -1e30)

    rows = [A0, B0, C0_l, A1, B1, C1, Az, Bz, Cz, An, Bn, Cn] + col_coefs
    face_data = jnp.stack(rows, axis=0).astype(jnp.float32).reshape(NCOEF, B * num_faces)

    # --- lane-dense pixel tiling ---
    H = W = image_size
    P = H * W
    total_rows = -(-P // 128)          # ceil(P / 128)
    MAX_ROWS = 128                     # 128*128 px/tile: ~2 MiB live planes, safe on v5e/v6e/v7x
    if total_rows <= MAX_ROWS:
        rows_tile = total_rows
        rows_pad = total_rows
    else:
        rows_tile = MAX_ROWS
        rows_pad = -(-total_rows // MAX_ROWS) * MAX_ROWS
    grid = (B, rows_pad // rows_tile)

    kernel = functools.partial(_raster_kernel, num_faces, W, H, rows_tile)
    out = pl.pallas_call(
        kernel,
        out_shape=jax.ShapeDtypeStruct((B, 3, rows_pad, 128), jnp.float32),
        grid=grid,
        in_specs=[pl.BlockSpec(memory_space=pltpu.MemorySpace.SMEM)],
        out_specs=pl.BlockSpec((1, 3, rows_tile, 128), lambda b, t: (b, 0, t, 0)),
        compiler_params=pltpu.CompilerParams(
            dimension_semantics=("parallel", "parallel")),
    )(face_data)

    out = out.reshape(B, 3, rows_pad * 128)[:, :, :P].reshape(B, 3, H, W)
    return out


if __name__ == "__main__":
    # TODO(synk): matplotlib/PIL image dumps, debug prints and
    # torch.cuda.empty_cache from the original forward are intentionally omitted.
    key = jax.random.PRNGKey(0)
    B, N, F_, image_size = 2, 16, 24, 16

    k1, k2, k3, k4 = jax.random.split(key, 4)
    xy = jax.random.uniform(k1, (B, N, 2), minval=-0.6, maxval=0.6)
    z = jax.random.uniform(k2, (B, N, 1), minval=-3.0, maxval=-2.0)  # in front of camera
    vertices = jnp.concatenate([xy, z], axis=-1).astype(jnp.float32)
    faces = jax.random.randint(k3, (F_, 3), 0, N, dtype=jnp.int32)
    vertex_colors = jax.random.uniform(k4, (B, N, 3), minval=0.0, maxval=1.0).astype(jnp.float32)

    shaded = differentiable_rasterizer(vertices, faces, vertex_colors, image_size)
    jax.block_until_ready(shaded)
    assert shaded.shape == (B, 3, image_size, image_size)
    assert bool(jnp.all(jnp.isfinite(shaded)))
    print("KERNEL_OK")
</pallas_src>

<mosaic_0001>
module attributes {stable_mosaic.version = 11 : i64} {
  func.func @_raster_kernel(%arg0: i32, %arg1: i32, %arg2: memref<21x48xf32, #tpu.memory_space<smem>>, %arg3: memref<1x3x2x128xf32, #tpu.memory_space<vmem>>) attributes {dimension_semantics = [#tpu.dimension_semantics<parallel>, #tpu.dimension_semantics<parallel>], iteration_bounds = array<i64: 2, 1>, scalar_prefetch = 0 : i64, scratch_operands = 0 : i64, tpu.core_type = #tpu.core_type<tc>, window_params = [{transform_indices = @transform_0, window_bounds = array<i64: 21, 48>}, {transform_indices = @transform_1, window_bounds = array<i64: 1, 3, 2, 128>}]} {
    %c2_i32 = arith.constant 2 : i32
    %0 = arith.muli %arg1, %c2_i32 : i32
    %1 = tpu.iota {dimensions = array<i32: 0>} : vector<2x128xi32>
    %2 = tpu.iota {dimensions = array<i32: 1>} : vector<2x128xi32>
    %3 = vector.broadcast %0 : i32 to vector<2x128xi32>
    %4 = arith.addi %3, %1 : vector<2x128xi32>
    %c128_i32 = arith.constant 128 : i32
    %5 = vector.broadcast %c128_i32 : i32 to vector<2x128xi32>
    %6 = arith.muli %4, %5 : vector<2x128xi32>
    %7 = arith.addi %6, %2 : vector<2x128xi32>
    %c4_i32 = arith.constant 4 : i32
    %8 = vector.broadcast %c4_i32 : i32 to vector<2x128xi32>
    %9 = arith.shrsi %7, %8 : vector<2x128xi32>
    %c15_i32 = arith.constant 15 : i32
    %10 = vector.broadcast %c15_i32 : i32 to vector<2x128xi32>
    %11 = arith.andi %7, %10 : vector<2x128xi32>
    %12 = arith.sitofp %11 : vector<2x128xi32> to vector<2x128xf32>
    %cst = arith.constant 5.000000e-01 : f32
    %13 = vector.broadcast %cst : f32 to vector<2x128xf32>
    %14 = arith.addf %12, %13 : vector<2x128xf32>
    %cst_0 = arith.constant 1.250000e-01 : f32
    %15 = vector.broadcast %cst_0 : f32 to vector<2x128xf32>
    %16 = arith.mulf %14, %15 : vector<2x128xf32>
    %cst_1 = arith.constant 1.000000e+00 : f32
    %17 = vector.broadcast %cst_1 : f32 to vector<2x128xf32>
    %18 = arith.subf %16, %17 : vector<2x128xf32>
    %19 = arith.sitofp %9 : vector<2x128xi32> to vector<2x128xf32>
    %cst_2 = arith.constant 5.000000e-01 : f32
    %20 = vector.broadcast %cst_2 : f32 to vector<2x128xf32>
    %21 = arith.addf %19, %20 : vector<2x128xf32>
    %cst_3 = arith.constant 1.250000e-01 : f32
    %22 = vector.broadcast %cst_3 : f32 to vector<2x128xf32>
    %23 = arith.mulf %21, %22 : vector<2x128xf32>
    %cst_4 = arith.constant 1.000000e+00 : f32
    %24 = vector.broadcast %cst_4 : f32 to vector<2x128xf32>
    %25 = arith.subf %23, %24 : vector<2x128xf32>
    %c24_i32 = arith.constant 24 : i32
    %26 = arith.muli %arg0, %c24_i32 : i32
    %cst_5 = arith.constant 0x7F800000 : f32
    %27 = vector.broadcast %cst_5 : f32 to vector<2x128xf32>
    %cst_6 = arith.constant 0.000000e+00 : f32
    %28 = vector.broadcast %cst_6 : f32 to vector<2x128xf32>
    %cst_7 = arith.constant 0.000000e+00 : f32
    %29 = vector.broadcast %cst_7 : f32 to vector<2x128xf32>
    %cst_8 = arith.constant 0.000000e+00 : f32
    %30 = vector.broadcast %cst_8 : f32 to vector<2x128xf32>
    %c0_i32 = arith.constant 0 : i32
    %c24_i32_9 = arith.constant 24 : i32
    %31 = arith.addi %c0_i32, %c24_i32_9 : i32
    %c1_i32 = arith.constant 1 : i32
    %32:4 = scf.for %arg4 = %c0_i32 to %31 step %c1_i32 iter_args(%arg5 = %27, %arg6 = %28, %arg7 = %29, %arg8 = %30) -> (vector<2x128xf32>, vector<2x128xf32>, vector<2x128xf32>, vector<2x128xf32>)  : i32 {
      %42 = arith.addi %26, %arg4 : i32
      %c0_20 = arith.constant 0 : index
      %43 = arith.index_cast %42 : i32 to index
      %44 = memref.load %arg2[%c0_20, %43] : memref<21x48xf32, #tpu.memory_space<smem>>
      %c1_21 = arith.constant 1 : index
      %45 = arith.index_cast %42 : i32 to index
      %46 = memref.load %arg2[%c1_21, %45] : memref<21x48xf32, #tpu.memory_space<smem>>
      %c2_22 = arith.constant 2 : index
      %47 = arith.index_cast %42 : i32 to index
      %48 = memref.load %arg2[%c2_22, %47] : memref<21x48xf32, #tpu.memory_space<smem>>
      %c3 = arith.constant 3 : index
      %49 = arith.index_cast %42 : i32 to index
      %50 = memref.load %arg2[%c3, %49] : memref<21x48xf32, #tpu.memory_space<smem>>
      %c4 = arith.constant 4 : index
      %51 = arith.index_cast %42 : i32 to index
      %52 = memref.load %arg2[%c4, %51] : memref<21x48xf32, #tpu.memory_space<smem>>
      %c5 = arith.constant 5 : index
      %53 = arith.index_cast %42 : i32 to index
      %54 = memref.load %arg2[%c5, %53] : memref<21x48xf32, #tpu.memory_space<smem>>
      %c6 = arith.constant 6 : index
      %55 = arith.index_cast %42 : i32 to index
      %56 = memref.load %arg2[%c6, %55] : memref<21x48xf32, #tpu.memory_space<smem>>
      %c7 = arith.constant 7 : index
      %57 = arith.index_cast %42 : i32 to index
      %58 = memref.load %arg2[%c7, %57] : memref<21x48xf32, #tpu.memory_space<smem>>
      %c8 = arith.constant 8 : index
      %59 = arith.index_cast %42 : i32 to index
      %60 = memref.load %arg2[%c8, %59] : memref<21x48xf32, #tpu.memory_space<smem>>
      %c9 = arith.constant 9 : index
      %61 = arith.index_cast %42 : i32 to index
      %62 = memref.load %arg2[%c9, %61] : memref<21x48xf32, #tpu.memory_space<smem>>
      %c10 = arith.constant 10 : index
      %63 = arith.index_cast %42 : i32 to index
      %64 = memref.load %arg2[%c10, %63] : memref<21x48xf32, #tpu.memory_space<smem>>
      %c11 = arith.constant 11 : index
      %65 = arith.index_cast %42 : i32 to index
      %66 = memref.load %arg2[%c11, %65] : memref<21x48xf32, #tpu.memory_space<smem>>
      %67 = vector.broadcast %44 : f32 to vector<2x128xf32>
      %68 = arith.mulf %67, %18 : vector<2x128xf32>
      %69 = vector.broadcast %46 : f32 to vector<2x128xf32>
      %70 = arith.mulf %69, %25 : vector<2x128xf32>
      %71 = arith.addf %68, %70 : vector<2x128xf32>
      %72 = vector.broadcast %48 : f32 to vector<2x128xf32>
      %73 = arith.addf %71, %72 : vector<2x128xf32>
      %74 = vector.broadcast %50 : f32 to vector<2x128xf32>
      %75 = arith.mulf %74, %18 : vector<2x128xf32>
      %76 = vector.broadcast %52 : f32 to vector<2x128xf32>
      %77 = arith.mulf %76, %25 : vector<2x128xf32>
      %78 = arith.addf %75, %77 : vector<2x128xf32>
      %79 = vector.broadcast %54 : f32 to vector<2x128xf32>
      %80 = arith.addf %78, %79 : vector<2x128xf32>
      %cst_23 = arith.constant 1.000000e+00 : f32
      %81 = vector.broadcast %cst_23 : f32 to vector<2x128xf32>
      %82 = arith.subf %81, %73 : vector<2x128xf32>
      %83 = arith.subf %82, %80 : vector<2x128xf32>
      %84 = vector.broadcast %56 : f32 to vector<2x128xf32>
      %85 = arith.mulf %84, %18 : vector<2x128xf32>
      %86 = vector.broadcast %58 : f32 to vector<2x128xf32>
      %87 = arith.mulf %86, %25 : vector<2x128xf32>
      %88 = arith.addf %85, %87 : vector<2x128xf32>
      %89 = vector.broadcast %60 : f32 to vector<2x128xf32>
      %90 = arith.addf %88, %89 : vector<2x128xf32>
      %91 = arith.minimumf %73, %80 : vector<2x128xf32>
      %92 = arith.minimumf %91, %83 : vector<2x128xf32>
      %cst_24 = arith.constant 0.000000e+00 : f32
      %93 = vector.broadcast %cst_24 : f32 to vector<2x128xf32>
      %94 = arith.cmpf oge, %92, %93 : vector<2x128xf32>
      %95 = arith.cmpf olt, %90, %arg5 : vector<2x128xf32>
      %96 = arith.andi %94, %95 : vector<2x128xi1>
      %97 = vector.broadcast %62 : f32 to vector<2x128xf32>
      %98 = arith.mulf %97, %18 : vector<2x128xf32>
      %99 = vector.broadcast %64 : f32 to vector<2x128xf32>
      %100 = arith.mulf %99, %25 : vector<2x128xf32>
      %101 = arith.addf %98, %100 : vector<2x128xf32>
      %102 = vector.broadcast %66 : f32 to vector<2x128xf32>
      %103 = arith.addf %101, %102 : vector<2x128xf32>
      %cst_25 = arith.constant 0.000000e+00 : f32
      %104 = vector.broadcast %cst_25 : f32 to vector<2x128xf32>
      %105 = arith.maximumf %103, %104 : vector<2x128xf32>
      %c12 = arith.constant 12 : index
      %106 = arith.index_cast %42 : i32 to index
      %107 = memref.load %arg2[%c12, %106] : memref<21x48xf32, #tpu.memory_space<smem>>
      %c13 = arith.constant 13 : index
      %108 = arith.index_cast %42 : i32 to index
      %109 = memref.load %arg2[%c13, %108] : memref<21x48xf32, #tpu.memory_space<smem>>
      %c14 = arith.constant 14 : index
      %110 = arith.index_cast %42 : i32 to index
      %111 = memref.load %arg2[%c14, %110] : memref<21x48xf32, #tpu.memory_space<smem>>
      %112 = vector.broadcast %107 : f32 to vector<2x128xf32>
      %113 = arith.mulf %112, %18 : vector<2x128xf32>
      %114 = vector.broadcast %109 : f32 to vector<2x128xf32>
      %115 = arith.mulf %114, %25 : vector<2x128xf32>
      %116 = arith.addf %113, %115 : vector<2x128xf32>
      %117 = vector.broadcast %111 : f32 to vector<2x128xf32>
      %118 = arith.addf %116, %117 : vector<2x128xf32>
      %119 = arith.mulf %118, %105 : vector<2x128xf32>
      %120 = arith.select %96, %119, %arg6 : vector<2x128xi1>, vector<2x128xf32>
      %c15 = arith.constant 15 : index
      %121 = arith.index_cast %42 : i32 to index
      %122 = memref.load %arg2[%c15, %121] : memref<21x48xf32, #tpu.memory_space<smem>>
      %c16 = arith.constant 16 : index
      %123 = arith.index_cast %42 : i32 to index
      %124 = memref.load %arg2[%c16, %123] : memref<21x48xf32, #tpu.memory_space<smem>>
      %c17 = arith.constant 17 : index
      %125 = arith.index_cast %42 : i32 to index
      %126 = memref.load %arg2[%c17, %125] : memref<21x48xf32, #tpu.memory_space<smem>>
      %127 = vector.broadcast %122 : f32 to vector<2x128xf32>
      %128 = arith.mulf %127, %18 : vector<2x128xf32>
      %129 = vector.broadcast %124 : f32 to vector<2x128xf32>
      %130 = arith.mulf %129, %25 : vector<2x128xf32>
      %131 = arith.addf %128, %130 : vector<2x128xf32>
      %132 = vector.broadcast %126 : f32 to vector<2x128xf32>
      %133 = arith.addf %131, %132 : vector<2x128xf32>
      %134 = arith.mulf %133, %105 : vector<2x128xf32>
      %135 = arith.select %96, %134, %arg7 : vector<2x128xi1>, vector<2x128xf32>
      %c18 = arith.constant 18 : index
      %136 = arith.index_cast %42 : i32 to index
      %137 = memref.load %arg2[%c18, %136] : memref<21x48xf32, #tpu.memory_space<smem>>
      %c19 = arith.constant 19 : index
      %138 = arith.index_cast %42 : i32 to index
      %139 = memref.load %arg2[%c19, %138] : memref<21x48xf32, #tpu.memory_space<smem>>
      %c20 = arith.constant 20 : index
      %140 = arith.index_cast %42 : i32 to index
      %141 = memref.load %arg2[%c20, %140] : memref<21x48xf32, #tpu.memory_space<smem>>
      %142 = vector.broadcast %137 : f32 to vector<2x128xf32>
      %143 = arith.mulf %142, %18 : vector<2x128xf32>
      %144 = vector.broadcast %139 : f32 to vector<2x128xf32>
      %145 = arith.mulf %144, %25 : vector<2x128xf32>
      %146 = arith.addf %143, %145 : vector<2x128xf32>
      %147 = vector.broadcast %141 : f32 to vector<2x128xf32>
      %148 = arith.addf %146, %147 : vector<2x128xf32>
      %149 = arith.mulf %148, %105 : vector<2x128xf32>
      %150 = arith.select %96, %149, %arg8 : vector<2x128xi1>, vector<2x128xf32>
      %151 = arith.select %96, %90, %arg5 : vector<2x128xi1>, vector<2x128xf32>
      scf.yield %151, %120, %135, %150 : vector<2x128xf32>, vector<2x128xf32>, vector<2x128xf32>, vector<2x128xf32>
    }
    %c24_i32_10 = arith.constant 24 : i32
    %c0 = arith.constant 0 : index
    %c0_11 = arith.constant 0 : index
    %c0_12 = arith.constant 0 : index
    %c0_13 = arith.constant 0 : index
    %33 = vector.load %arg3[%c0, %c0_11, %c0_12, %c0_13] : memref<1x3x2x128xf32, #tpu.memory_space<vmem>>, vector<1x1x2x128xf32>
    %34 = vector.shape_cast %33 : vector<1x1x2x128xf32> to vector<2x128xf32>
    %35 = vector.shape_cast %32#1 : vector<2x128xf32> to vector<1x1x2x128xf32>
    tpu.vector_store %arg3[%c0, %c0_11, %c0_12, %c0_13], %35 {strides = array<i32>} : memref<1x3x2x128xf32, #tpu.memory_space<vmem>>, vector<1x1x2x128xf32>,
    %c0_14 = arith.constant 0 : index
    %c1 = arith.constant 1 : index
    %c0_15 = arith.constant 0 : index
    %c0_16 = arith.constant 0 : index
    %36 = vector.load %arg3[%c0_14, %c1, %c0_15, %c0_16] : memref<1x3x2x128xf32, #tpu.memory_space<vmem>>, vector<1x1x2x128xf32>
    %37 = vector.shape_cast %36 : vector<1x1x2x128xf32> to vector<2x128xf32>
    %38 = vector.shape_cast %32#2 : vector<2x128xf32> to vector<1x1x2x128xf32>
    tpu.vector_store %arg3[%c0_14, %c1, %c0_15, %c0_16], %38 {strides = array<i32>} : memref<1x3x2x128xf32, #tpu.memory_space<vmem>>, vector<1x1x2x128xf32>,
    %c0_17 = arith.constant 0 : index
    %c2 = arith.constant 2 : index
    %c0_18 = arith.constant 0 : index
    %c0_19 = arith.constant 0 : index
    %39 = vector.load %arg3[%c0_17, %c2, %c0_18, %c0_19] : memref<1x3x2x128xf32, #tpu.memory_space<vmem>>, vector<1x1x2x128xf32>
    %40 = vector.shape_cast %39 : vector<1x1x2x128xf32> to vector<2x128xf32>
    %41 = vector.shape_cast %32#3 : vector<2x128xf32> to vector<1x1x2x128xf32>
    tpu.vector_store %arg3[%c0_17, %c2, %c0_18, %c0_19], %41 {strides = array<i32>} : memref<1x3x2x128xf32, #tpu.memory_space<vmem>>, vector<1x1x2x128xf32>,
    return
  }
  func.func @transform_0(%arg0: i32, %arg1: i32) -> (i32, i32) {
    %c0_i32 = arith.constant 0 : i32
    %c0_i32_0 = arith.constant 0 : i32
    %c0_i32_1 = arith.constant 0 : i32
    return %c0_i32, %c0_i32_0 : i32, i32
  }
  func.func @transform_1(%arg0: i32, %arg1: i32) -> (i32, i32, i32, i32) {
    %c0_i32 = arith.constant 0 : i32
    %c0_i32_0 = arith.constant 0 : i32
    %c0_i32_1 = arith.constant 0 : i32
    return %arg0, %c0_i32, %arg1, %c0_i32_0 : i32, i32, i32, i32
  }
}

</mosaic_0001>

<bundles_post_ra>
// kernel: tpu_custom_call.1
= control target key start
LH: loop header
LB: loop body
LE: loop exit
PB: predicated region body
PF: predicated region fallthrough
CT: control target
= control target key end

     0   :  { %s1040_s0 = inlined_call_operand.hbm [shape: f32[21,48], index: 0, kind: input, shape index: {}]   ;;  %s1041_s1 = inlined_call_operand.hbm [shape: f32[2,3,2,128], index: 1, kind: output, shape index: {}]  }
   0x1   :  { %1043 = sst [smem:[#allocation8_spill]] %s1040_s0 }
   0x2   :  { %6 = vsyncpa [#allocation4], 0 }
   0x3   :  { %7 = vsyncpa [#allocation3], 0 }
   0x4   :  { %9 = vsyncpa [#allocation3 + $0x1], 0  ;;  %s750_s6 = smov 0   ;;  %s752_s7 = smov 0  }
   0x5   :  { %s754_s8 = smov 0   ;;  %s756_s9 = smov 0  }
   0x6   :  { %s758_s10 = smov 0   ;;  %s760_s11 = smov 0  }
   0x7 LB: > { %s412_s12 = sadd.s32 4294967295, %s712_s11   ;;  %s413_s13 = sadd.s32 4294967294, %s712_s11   ;;  %s712_s11 = sphi %s760_s11, %s15_s11   ;;  %s708_s10 = sphi %s758_s10, %s1060_s10   ;;  %s704_s9 = sphi %s756_s9, %s1059_s9   ;;  %s700_s8 = sphi %s754_s8, %s1058_s8   ;;  %s696_s7 = sphi %s752_s7, %s1057_s7   ;;  %s692_s6 = sphi %s750_s6, %s1056_s6  }
   0x8   : > { %s27_s14 = sadd.s32 1, %s708_s10  ;;  %s57_s15 = sadd.s32 1, %s700_s8 }
   0x9   : > { %p29_p0 = scmp.ge.s32.totalorder %s27_s14, 2  ;;  %p67_p1 = scmp.ne.s32.totalorder %s700_s8, %s696_s7 }
   0xa   : > { %p68_p2 = scmp.eq.s32.totalorder %s412_s12, 1  ;;  %p73_p3 = scmp.ne.s32.totalorder %s696_s7, %s692_s6 }
   0xb   : > { %s1062_s14 = smov (%p29_p0, %s27_s14), 0  ;;  %p74_p5 = scmp.eq.s32.totalorder %s413_s13, 1 }
   0xc   : > { %p790_p4 = por %p68_p2, %p67_p1  ;;  %s52_s17 = ssub.s32 %s708_s10, %s1062_s14 }
   0xd   : > { %p414_p6 = scmp.ge.s32.totalorder %s712_s11, 1  ;;  %p55_p7 = scmp.eq.s32.totalorder %s52_s17, 0 }
   0xe   : > { %p797_p8 = por %p74_p5, %p73_p3  ;;  %p81_p9 = scmp.lt.s32.totalorder %s712_s11, 3 }
   0xf   : > { %s803_s19 = scalar_select %p55_p7, %s700_s8, %s57_s15  }
  0x10   : > { %p805_p10 = pnand %p414_p6, %p81_p9  ;;  %p809_p11 = scmp.eq.s32.totalorder %s412_s12, 0 }
  0x11   : > { %s1048_s0 = sld [smem:[#allocation8_spill]] }
  0x12   : > { %p493_p12 = pneg %p805_p10 }
  0x14   : > { %p494_p13 = pnand %p809_p11, %p493_p12 }
  0x16   : > { %p599_p1 = pneg %p494_p13 }
  0x17   : > { %s597_s24 = scalar_lea.hbm %s1048_s0, 384 }
  0x18   : > { %p598_p0 = scmp.ne.s32.totalorder %s1048_s0, %s597_s24  ;;  %p604_p5 = scmp.lt.u32.totalorder %s597_s24, %s1048_s0 }
  0x1a   : > { %p600_p2 = pnand %p599_p1, %p598_p0 }
  0x1c   : > { %p601_p3 = pneg %p600_p2 }
  0x1e   : > { %p606_p6 = pnand %p604_p5, %p601_p3 }
  0x20   : > { %609 = shalt.err (!%p606_p6)
}
  0x21   : > { %s734_s29 = smov [#allocation2]   ;;  %s735_s30 = smov 128  }
  0x22   : > { %s736_s2 = smov 8   ;;  %107 = sbr.rel (%p805_p10) target bundleno = 133 (0x85), region = 24 }
  0x23   : > { %496 = dma.hbm_to_smem (!%p494_p13), %s1048_s0, 384, %s734_s29, [#allocation4], %s735_s30, %s735_s30, %s736_s2  }
  0x29   : > { %683 = dma.done.wait (%p809_p11), [#allocation4], 384  }
  0x2a   : > { %685 = vsyncadd (%p809_p11), [#allocation4], 4294966912 }
  0x2b   : > { %113 = sfence }
  0x2c   : > { %s1042_s5 = sand.u32 1, %s696_s7   ;;  %v124_v0 = vlaneseq  ;;  %v845_v15 = vmov 0.0   ;;  %v847_v16 = vmov 0.0   ;;  %v849_v17 = vmov 0.0   ;;  %s853_s17 = smov 0  }
  0x2d   : > { %s485_s13 = smul.u32 6, %s1042_s5  ;;  %v851_v18 = vmov inf  }
  0x2e   : > { %v125_v1 = vshrl.u32 %v124_v0, 7  ;;  %v127_v2 = vand.u32 127, %v124_v0 }
  0x2f   : > { %s843_s15 = scalar_lea.vmem [#allocation5], %s485_s13 }
  0x30   : > { %v130_v3 = vmul.u32 128, %v125_v1 }
  0x32   : > { %v131_v4 = vadd.s32 %v130_v3, %v127_v2 }
  0x34   : > { %v132_v5 = vshra.s32 %v131_v4, 4  ;;  %v133_v6 = vand.u32 15, %v131_v4 }
  0x36   : > { %v134_v7 = vcvt.s32.f32 %v133_v6  ;;  %v138_v8 = vcvt.s32.f32 %v132_v5 }
  0x38   : > { %v135_v9 = vadd.f32 0.5, %v134_v7  ;;  %v139_v10 = vadd.f32 0.5, %v138_v8 }
  0x3a   : > { %v136_v11 = vmul.f32 0.125, %v135_v9  ;;  %v140_v12 = vmul.f32 0.125, %v139_v10 }
  0x3c   : > { %v839_v13 = vadd.f32 -1.0, %v136_v11  ;;  %v841_v14 = vadd.f32 -1.0, %v140_v12 }
  0x3d LB: >> { %s1049_s12 = smul.u32 24, %s704_s9  ;;  %s732_s17 = sphi %s853_s17, %s148_s17   ;;  %v728_v18 = vphi %v851_v18, %v302_v18   ;;  %v724_v17 = vphi %v849_v17, %v1054_v17   ;;  %v720_v16 = vphi %v847_v16, %v1053_v16   ;;  %v716_v15 = vphi %v845_v15, %v1052_v15  }
  0x3f   : >> { %s153_s20 = sadd.s32 %s732_s17, %s1049_s12  ;;  %s148_s17 = sadd.s32 1, %s732_s17  }
  0x40   : >> { %s154_s21 = sld [smem:[#allocation2 + %s153_s20]]  ;;  %s155_s22 = sshra.s32 %s153_s20, 7 }
  0x41   : >> { %s873_s23 = sshll.u32 %s155_s22, 7  ;;  %s875_s24 = sand.u32 127, %s153_s20 }
  0x42   : >> { %s446_s25 = sadd.s32 128, %s873_s23  ;;  %s448_s26 = sadd.s32 256, %s873_s23 }
  0x43   : >> { %s161_s27 = sadd.s32 %s446_s25, %s875_s24  ;;  %s165_s28 = sadd.s32 %s448_s26, %s875_s24 }
  0x44   : >> { %s162_s29 = sld [smem:[#allocation2 + %s161_s27]]  ;;  %s450_s2 = sadd.s32 384, %s873_s23 }
  0x45   : >> { %s881_s30 = sld [smem:[#allocation2 + %s165_s28]]  ;;  %s452_s3 = sadd.s32 512, %s873_s23 }
  0x46   : >> { %s169_s4 = sadd.s32 %s450_s2, %s875_s24  ;;  %s173_s13 = sadd.s32 %s452_s3, %s875_s24  ;;  %v203_v19 = vstv %s154_s21 }
  0x47   : >> { %s170_s20 = sld [smem:[#allocation2 + %s169_s4]]  ;;  %s454_s12 = sadd.s32 640, %s873_s23  ;;  %v204_v20 = vmul.f32 %v839_v13, %v203_v19 }
  0x48   : >> { %s174_s22 = sld [smem:[#allocation2 + %s173_s13]]  ;;  %s456_s5 = sadd.s32 768, %s873_s23 }
  0x49   : >> { %s177_s0 = sadd.s32 %s454_s12, %s875_s24  ;;  %s181_s25 = sadd.s32 %s456_s5, %s875_s24 }
  0x4a   : >> { %s892_s26 = sld [smem:[#allocation2 + %s177_s0]]  ;;  %v205_v21 = vstv %s162_s29  ;;  %s458_s28 = sadd.s32 896, %s873_s23 }
  0x4b   : >> { %s894_s27 = sld [smem:[#allocation2 + %s181_s25]]  ;;  %s460_s21 = sadd.s32 1024, %s873_s23  ;;  %v206_v22 = vmul.f32 %v841_v14, %v205_v21  ;;  %v208_v23 = vstv %s881_s30 }
  0x4c   : >> { %s185_s2 = sadd.s32 %s458_s28, %s875_s24  ;;  %s189_s3 = sadd.s32 %s460_s21, %s875_s24 }
  0x4d   : >> { %s186_s5 = sld [smem:[#allocation2 + %s185_s2]]  ;;  %v207_v24 = vadd.f32 %v206_v22, %v204_v20  ;;  %v210_v25 = vstv %s170_s20  ;;  %s462_s0 = sadd.s32 1152, %s873_s23 }
  0x4e   : >> { %s902_s12 = sld [smem:[#allocation2 + %s189_s3]]  ;;  %v212_v26 = vstv %s174_s22  ;;  %s464_s29 = sadd.s32 1280, %s873_s23  ;;  %v211_v27 = vmul.f32 %v839_v13, %v210_v25 }
  0x4f   : >> { %v213_v28 = vmul.f32 %v841_v14, %v212_v26  ;;  %s193_s4 = sadd.s32 %s462_s0, %s875_s24  ;;  %s197_s30 = sadd.s32 %s464_s29, %s875_s24  ;;  %v209_v29 = vadd.f32 %v208_v23, %v207_v24 }
  0x50   : >> { %s194_s13 = sld [smem:[#allocation2 + %s193_s4]]  ;;  %v215_v31 = vstv %s892_s26  ;;  %s466_s20 = sadd.s32 1408, %s873_s23 }
  0x51   : >> { %s198_s25 = sld [smem:[#allocation2 + %s197_s30]]  ;;  %v214_v30 = vadd.f32 %v213_v28, %v211_v27  ;;  %v219_v32 = vstv %s894_s27  ;;  %v217_v33 = vsub.f32 1.0, %v209_v29  ;;  %s468_s22 = sadd.s32 1536, %s873_s23 }
  0x52   : >> { %s201_s28 = sadd.s32 %s466_s20, %s875_s24  ;;  %v220_v35 = vmul.f32 %v839_v13, %v219_v32  ;;  %s241_s21 = sadd.s32 %s468_s22, %s875_s24 }
  0x53   : >> { %v216_v34 = vadd.f32 %v215_v31, %v214_v30  ;;  %s917_s2 = sld [smem:[#allocation2 + %s201_s28]]  ;;  %v221_v36 = vstv %s186_s5  ;;  %s470_s26 = sadd.s32 1664, %s873_s23 }
  0x54   : >> { %s919_s3 = sld [smem:[#allocation2 + %s241_s21]]  ;;  %v222_v38 = vmul.f32 %v841_v14, %v221_v36  ;;  %s472_s27 = sadd.s32 1792, %s873_s23  ;;  %v224_v40 = vstv %s902_s12 }
  0x55   : >> { %v218_v37 = vsub.f32 %v217_v33, %v216_v34  ;;  %v226_v39 = vmin.f32 %v209_v29, %v216_v34  ;;  %s245_s0 = sadd.s32 %s470_s26, %s875_s24  ;;  %s249_s29 = sadd.s32 %s472_s27, %s875_s24 }
  0x56   : >> { %v223_v41 = vadd.f32 %v222_v38, %v220_v35  ;;  %v231_v43 = vstv %s194_s13  ;;  %s246_s5 = sld [smem:[#allocation2 + %s245_s0]]  ;;  %s474_s30 = sadd.s32 1920, %s873_s23 }
  0x57   : >> { %v227_v42 = vmin.f32 %v226_v39, %v218_v37  ;;  %v233_v44 = vstv %s198_s25  ;;  %s927_s4 = sld [smem:[#allocation2 + %s249_s29]]  ;;  %v232_v45 = vmul.f32 %v839_v13, %v231_v43  ;;  %s476_s12 = sadd.s32 2048, %s873_s23 }
  0x58   : >> { %v234_v46 = vmul.f32 %v841_v14, %v233_v44  ;;  %v225_v47 = vadd.f32 %v224_v40, %v223_v41  ;;  %s262_s20 = sadd.s32 %s474_s30, %s875_s24  ;;  %s266_s22 = sadd.s32 %s476_s12, %s875_s24 }
  0x59   : >> { %vm228_vm0 = vcmp.ge.f32.partialorder %v227_v42, 0.0  ;;  %v236_v49 = vstv %s917_s2  ;;  %s263_s13 = sld [smem:[#allocation2 + %s262_s20]]  ;;  %s478_s28 = sadd.s32 2176, %s873_s23 }
  0x5a   : >> { %v235_v48 = vadd.f32 %v234_v46, %v232_v45  ;;  %v251_v50 = vstv %s919_s3  ;;  %s267_s25 = sld [smem:[#allocation2 + %s266_s22]]  ;;  %vm229_vm1 = vcmp.lt.f32.partialorder %v225_v47, %v728_v18  ;;  %s480_s21 = sadd.s32 2304, %s873_s23 }
  0x5b   : >> { %vm940_vm2 = vmand %vm228_vm0, %vm229_vm1  ;;  %v252_v53 = vmul.f32 %v839_v13, %v251_v50  ;;  %s270_s2 = sadd.s32 %s478_s28, %s875_s24  ;;  %s283_s3 = sadd.s32 %s480_s21, %s875_s24 }
  0x5c   : >> { %v237_v52 = vadd.f32 %v236_v49, %v235_v48  ;;  %v253_v54 = vstv %s246_s5  ;;  %s271_s26 = sld [smem:[#allocation2 + %s270_s2]]  ;;  %v302_v18 = vsel %vm940_vm2, %v225_v47, %v728_v18   ;;  %s482_s0 = sadd.s32 2432, %s873_s23 }
  0x5d   : >> { %s284_s27 = sld [smem:[#allocation2 + %s283_s3]]  ;;  %v254_v55 = vmul.f32 %v841_v14, %v253_v54  ;;  %s484_s29 = sadd.s32 2560, %s873_s23  ;;  %v256_v56 = vstv %s927_s4 }
  0x5e   : >> { %s287_s30 = sadd.s32 %s482_s0, %s875_s24  ;;  %s291_s12 = sadd.s32 %s484_s29, %s875_s24  ;;  %v238_v57 = vmax.f32 %v237_v52, 0.0 }
  0x5f   : >> { %v255_v58 = vadd.f32 %v254_v55, %v252_v53  ;;  %v272_v59 = vstv %s263_s13  ;;  %s288_s20 = sld [smem:[#allocation2 + %s287_s30]]  ;;  %p145_p7 = scmp.ge.s32.totalorder %s148_s17, 24  }
  0x60   : >> { %v274_v60 = vstv %s267_s25  ;;  %s292_s22 = sld [smem:[#allocation2 + %s291_s12]]  ;;  %v273_v61 = vmul.f32 %v839_v13, %v272_v59  ;;  %s486_s23 = smul.u32 (%p145_p7), 96, %s704_s9 }
  0x61   : >> { %v275_v62 = vmul.f32 %v841_v14, %v274_v60  ;;  %v257_v63 = vadd.f32 %v256_v56, %v255_v58  ;;  %s323_s24 = sshll.u32 (%p145_p7), %s843_s15, 4  ;;  %s1055_s17 = sand.u32 (%p145_p7), 1, %s696_s7   ;;  %s990_s24 = int_to_ptr.vmem [resolvable:$true] %s323_s24 }
  0x62   : >> { %v277_v1 = vstv %s271_s26  ;;  %s988_s13 = scalar_lea.hbm (%p145_p7), %s1041_s1, %s486_s23  ;;  %s994_s25 = scalar_lea.sflag (%p145_p7), [#allocation3], %s1055_s17 }
  0x63   : >> { %v276_v0 = vadd.f32 %v275_v62, %v273_v61  ;;  %v293_v2 = vstv %s284_s27  ;;  %v258_v3 = vmul.f32 %v257_v63, %v238_v57  ;;  %s610_s28 = scalar_lea.vmem (%p145_p7), %s990_s24, 96  ;;  %s737_s9 = smov (%p145_p7), [#allocation5]  }
  0x64   : >> { %v294_v5 = vmul.f32 %v839_v13, %v293_v2  ;;  %p611_p9 = scmp.ne.s32.totalorder (%p145_p7), %s990_s24, %s610_s28 }
  0x65   : >> { %v278_v4 = vadd.f32 %v277_v1, %v276_v0  ;;  %v259_v6 = vsel %vm940_vm2, %v258_v3, %v724_v17   ;;  %v295_v7 = vstv %s288_s20 }
  0x66   : >> { %v296_v9 = vmul.f32 %v841_v14, %v295_v7  ;;  %v298_v10 = vstv %s292_s22  ;;  %v1054_v17 = vmov %v259_v6  ;;  %303 = vst [vmem:[%s843_s15] sm:$0x3] (%p145_p7), %v259_v6  ;;  %p612_p10 = pnand (%p145_p7), %p611_p9, %p790_p4 }
  0x67   : >> { %v279_v8 = vmul.f32 %v278_v4, %v238_v57 }
  0x68   : >> { %v297_v12 = vadd.f32 %v296_v9, %v294_v5  ;;  %p613_p11 = pneg (%p145_p7), %p612_p10 }
  0x69   : >> { %v280_v11 = vsel %vm940_vm2, %v279_v8, %v720_v16   ;;  %147 = sbr.rel (!%p145_p7) target bundleno = 61 (0x3d), region = 70 }
  0x6a   : >> { %v299_v19 = vadd.f32 %v298_v10, %v297_v12  ;;  %v1053_v16 = vmov %v280_v11  ;;  %440 = vst [vmem:[%s843_s15 + $0x2] sm:$0x3] (%p145_p7), %v280_v11 }
  0x6c   : >> { %v300_v20 = vmul.f32 %v299_v19, %v238_v57 }
  0x6e   : >> { %v301_v21 = vsel %vm940_vm2, %v300_v20, %v716_v15  }
  0x6f   : >> { %v1052_v15 = vmov %v301_v21  ;;  %441 = vst [vmem:[%s843_s15 + $0x4] sm:$0x3] (%p145_p7), %v301_v21  ;;  %s614_s15 = sshll.u32 (%p145_p7), %s737_s9, 4  ;;  %s615_s15 = int_to_ptr.vmem [resolvable:$false] %s614_s15 }
  0x70   : > { %s616_s21 = scalar_lea.vmem %s615_s15, 192  ;;  %p617_p12 = scmp.lt.s32.totalorder %s990_s24, %s615_s15 }
  0x71   : > { %p618_p13 = scmp.lt.s32.totalorder %s616_s21, %s610_s28 }
  0x73   : > { %p619_p0 = por %p618_p13, %p617_p12 }
  0x75   : > { %p620_p1 = pnand %p619_p0, %p613_p11 }
  0x77   : > { %623 = shalt.err (!%p620_p1)
}
  0x78   : > { %s624_s2 = scalar_lea.hbm %s988_s13, 96  ;;  %s628_s27 = scalar_lea.hbm %s1041_s1, 192 }
  0x79   : > { %p625_p2 = scmp.ne.s32.totalorder %s988_s13, %s624_s2  ;;  %p629_p6 = scmp.lt.u32.totalorder %s988_s13, %s1041_s1 }
  0x7a   : > { %p630_p7 = scmp.lt.u32.totalorder %s628_s27, %s624_s2  ;;  %p632_p10 = scmp.lt.u32.totalorder %s624_s2, %s988_s13 }
  0x7b   : > { %p626_p3 = pnand %p625_p2, %p790_p4 }
  0x7c   : > { %p631_p9 = por %p630_p7, %p629_p6 }
  0x7d   : > { %p627_p5 = pneg %p626_p3 }
  0x7e   : > { %p633_p11 = por %p632_p10, %p631_p9 }
  0x80   : > { %p634_p12 = pnand %p633_p11, %p627_p5 }
  0x82   : > { %637 = shalt.err (!%p634_p12)
}
  0x83   : > { %s738_s30 = smov 32   ;;  %s739_s12 = smov 2  }
  0x84   : > { %491 = dma.vmem_to_hbm [thread:$0]  (%p790_p4), %s990_s24, 96, %s988_s13, %s994_s25, %s738_s30, %s738_s30, %s739_s12  }
  0x85 PF: > { %p503_p13 = scmp.ge.s32.totalorder %s712_s11, 2  ;;  %s338_s20 = sand.u32 1, %s692_s6  }
  0x86   : > { %s339_s22 = scalar_lea.sflag [#allocation3], %s338_s20 }
  0x87   : > { %p498_p0 = pnand %p503_p13, %p797_p8 }
  0x89   : > { %687 = dma.done.wait (!%p498_p0), %s339_s22, 96  }
  0x8a   : > { %689 = vsyncadd (!%p498_p0), %s339_s22, 4294967200  ;;  %s15_s11 = sadd.s32 1, %s712_s11   ;;  %s1056_s6 = smov %s696_s7 }
  0x8b   : > { %p12_p1 = scmp.ge.s32.totalorder %s15_s11, 4   ;;  %s1057_s7 = smov %s700_s8 }
  0x8c   : > { %s1058_s8 = smov %s803_s19  ;;  %s1059_s9 = smov %s708_s10 }
  0x8d   : > { %s1060_s10 = smov %s1062_s14  ;;  %14 = sbr.rel (!%p12_p1) target bundleno = 7 (0x7), region = 81 }
  0x94   :  { %344 = vsyncpa [#allocation3], 1 }
  0x95   :  { %346 = vsyncpa [#allocation3 + $0x1], 1 }
  0x96   :  { %347 = vsyncpa [#allocation4], 1 }
  0x97   :  { %349 = vsyncpa [#allocation4 + $0x1], 1 }

</bundles_post_ra>
